<compile_context>
chip_gen: v7x
topology: tpu7x:2x2x1
jax: 0.10.0
libtpu: 0.0.40
codegen_flags: <defaults>
</compile_context>

<pallas_src>
import math
import functools

import jax
import jax.numpy as jnp
from jax import lax
from jax.experimental import pallas as pl
from jax.experimental.pallas import tpu as pltpu


# --------------------------------------------------------------------------
# helpers
# --------------------------------------------------------------------------
def _round_up(x, m):
    return (x + m - 1) // m * m


def _vmem_limit_bytes():
    """~3/4 of physical VMEM, capped at 96 MiB (v5e/v6e: 96 MiB, v7x: 48 MiB)."""
    try:
        cap = int(pltpu.get_tpu_info().vmem_capacity_bytes)
    except Exception:
        cap = 64 * 1024 * 1024  # conservative (v7x-sized) fallback
    return max(32 * 1024 * 1024, min(96 * 1024 * 1024, (cap * 3) // 4))


# --------------------------------------------------------------------------
# Tiled linear kernel:  x (M, K) @ w (N, K)^T -> (M, N)
#   weight kept in torch nn.Linear layout, contraction on last dims.
#   Optional per-output-channel scale (weight-only int8 quant): the int8
#   weight tile is cast to the activation dtype after DMA (1 byte/weight of
#   HBM traffic) and the f32 accumulator is scaled at finalize.
# --------------------------------------------------------------------------
def _matmul_nt_kernel(x_ref, w_ref, o_ref, acc_ref):
    k = pl.program_id(2)

    @pl.when(k == 0)
    def _init():
        acc_ref[...] = jnp.zeros_like(acc_ref)

    w = w_ref[...]
    if w.dtype != x_ref.dtype:            # int8 / bf16 weights -> act dtype
        w = w.astype(x_ref.dtype)
    acc_ref[...] += lax.dot_general(
        x_ref[...], w,
        dimension_numbers=(((1,), (1,)), ((), ())),
        preferred_element_type=jnp.float32,
    )

    @pl.when(k == pl.num_programs(2) - 1)
    def _fin():
        o_ref[...] = acc_ref[...].astype(o_ref.dtype)


def _matmul_nt_scaled_kernel(x_ref, w_ref, s_ref, o_ref, acc_ref):
    k = pl.program_id(2)

    @pl.when(k == 0)
    def _init():
        acc_ref[...] = jnp.zeros_like(acc_ref)

    w = w_ref[...]
    if w.dtype != x_ref.dtype:
        w = w.astype(x_ref.dtype)
    acc_ref[...] += lax.dot_general(
        x_ref[...], w,
        dimension_numbers=(((1,), (1,)), ((), ())),
        preferred_element_type=jnp.float32,
    )

    @pl.when(k == pl.num_programs(2) - 1)
    def _fin():
        # per-output-channel dequant folded into the finalize (one pass).
        o_ref[...] = (acc_ref[...] * s_ref[...]).astype(o_ref.dtype)


def linear_no_bias(x, w_torch_layout, w_scale=None, *, tm=512, tn=512, tk=512):
    """x: (M, K); w_torch_layout: (N, K) (PyTorch nn.Linear weight layout).

    If `w_scale` (shape (N,), f32) is given, `w_torch_layout` is expected to be
    an int8 (or low-precision) weight and the output is
        x @ (w.astype(f32) * w_scale[:, None]).T
    Returns (M, N) in x.dtype.
    """
    M, K = x.shape
    N, K2 = w_torch_layout.shape
    assert K == K2, "weight / activation K mismatch"

    # Clamp tiles to the full dim when the dim is small (a block equal to the
    # full array dim is always legal wrt the (8,128) rule).
    tm_, tn_, tk_ = min(M, tm), min(N, tn), min(K, tk)

    # Padding is a *fallback* for odd shapes only.  Baichuan-13B dims
    # (5120 / 15360) divide the default tiles, so the weight is never copied
    # at runtime.  # TODO(synk): pad weights once at model-load time instead.
    Mp, Np, Kp = _round_up(M, tm_), _round_up(N, tn_), _round_up(K, tk_)
    xp = x if (Mp, Kp) == (M, K) else jnp.pad(x, ((0, Mp - M), (0, Kp - K)))
    wp = (w_torch_layout if (Np, Kp) == (N, K)
          else jnp.pad(w_torch_layout, ((0, Np - N), (0, Kp - K))))

    in_specs = [
        pl.BlockSpec((tm_, tk_), lambda i, j, k: (i, k)),
        pl.BlockSpec((tn_, tk_), lambda i, j, k: (j, k)),
    ]
    args = [xp, wp]
    if w_scale is not None:
        s2 = w_scale.reshape(1, N).astype(jnp.float32)
        if Np != N:
            s2 = jnp.pad(s2, ((0, 0), (0, Np - N)))
        in_specs.append(pl.BlockSpec((1, tn_), lambda i, j, k: (0, j)))
        args.append(s2)
        kernel = _matmul_nt_scaled_kernel
    else:
        kernel = _matmul_nt_kernel

    out = pl.pallas_call(
        kernel,
        out_shape=jax.ShapeDtypeStruct((Mp, Np), x.dtype),
        grid_spec=pltpu.PrefetchScalarGridSpec(
            num_scalar_prefetch=0,
            grid=(Mp // tm_, Np // tn_, Kp // tk_),
            in_specs=in_specs,
            out_specs=pl.BlockSpec((tm_, tn_), lambda i, j, k: (i, j)),
            scratch_shapes=[pltpu.VMEM((tm_, tn_), jnp.float32)],
        ),
        compiler_params=pltpu.CompilerParams(
            dimension_semantics=("parallel", "parallel", "arbitrary"),
            vmem_limit_bytes=_vmem_limit_bytes(),
        ),
    )(*args)

    if (Mp, Np) != (M, N):
        out = out[:M, :N]
    return out


# --------------------------------------------------------------------------
# Flash-attention core (online softmax, kv-tiled)
#   per grid step: hb heads x tq query rows x tkv kv rows
#   scores = (q*scale) @ k^T [+ mask, clamp @ finfo.min] ; online softmax ; PV
# --------------------------------------------------------------------------
def _flash_body(q_ref, k_ref, v_ref, mask, o_ref, m_sc, l_sc, acc_sc,
                *, scale, kv_valid, tkv):
    kv = pl.program_id(2)

    @pl.when(kv == 0)
    def _init():
        m_sc[...] = jnp.full_like(m_sc, -jnp.inf)
        l_sc[...] = jnp.zeros_like(l_sc)
        acc_sc[...] = jnp.zeros_like(acc_sc)

    # Fold the softmax scale into q (q tile is tkv/D times smaller than the
    # scores slab -> saves a full VALU pass per kv step).
    q = q_ref[...] * scale               # (hb, tq, D), native dtype -> MXU
    k = k_ref[...]                       # (hb, tkv, D)
    v = v_ref[...]                       # (hb, tkv, D)

    # QK^T without an explicit transpose (contract last dims, batch over heads)
    s = jnp.einsum("hqd,hkd->hqk", q, k, preferred_element_type=jnp.float32)

    if mask is not None:
        # torch: attn_weights = max(attn_weights + mask, finfo.min)
        s = s + mask.astype(jnp.float32)       # (1, tq, tkv) broadcast over heads
        s = jnp.maximum(s, jnp.finfo(jnp.float32).min)
    if kv_valid is not None:
        # In-kernel padding mask for the no-external-mask path: nothing is
        # streamed from HBM for out-of-range kv columns.
        col = kv * tkv + lax.broadcasted_iota(jnp.int32, s.shape, 2)
        s = jnp.where(col < kv_valid, s, -jnp.inf)

    m_prev = m_sc[...]                                   # (hb, tq, 1)
    m_new = jnp.maximum(m_prev, jnp.max(s, axis=-1, keepdims=True))
    # NOTE: a block whose row is fully masked contributes a partial with
    # m == finfo.min; once a later block has any valid score,
    # alpha = exp(finfo.min - m_new) underflows to exactly 0 in f32 and the
    # bogus partial is discarded -- this reproduces torch's clamped-softmax
    # semantics (uniform weights only if *every* position is masked).
    alpha = jnp.exp(m_prev - m_new)
    p = jnp.exp(s - m_new)
    l_sc[...] = alpha * l_sc[...] + jnp.sum(p, axis=-1, keepdims=True)
    acc_sc[...] = alpha * acc_sc[...] + jnp.einsum(
        "hqk,hkd->hqd", p.astype(v.dtype), v,
        preferred_element_type=jnp.float32)
    m_sc[...] = m_new

    @pl.when(kv == pl.num_programs(2) - 1)
    def _fin():
        # approx reciprocal runs on the EUP (free slot); slightly lower
        # precision than an exact divide, fine for inference.
        inv = pl.reciprocal(l_sc[...], approx=True)
        o_ref[...] = (acc_sc[...] * inv).astype(o_ref.dtype)


def _flash_kernel_masked(q_ref, k_ref, v_ref, mask_ref, o_ref,
                         m_sc, l_sc, acc_sc, *, scale, kv_valid, tkv):
    _flash_body(q_ref, k_ref, v_ref, mask_ref[...], o_ref, m_sc, l_sc, acc_sc,
                scale=scale, kv_valid=kv_valid, tkv=tkv)


def _flash_kernel_nomask(q_ref, k_ref, v_ref, o_ref,
                         m_sc, l_sc, acc_sc, *, scale, kv_valid, tkv):
    _flash_body(q_ref, k_ref, v_ref, None, o_ref, m_sc, l_sc, acc_sc,
                scale=scale, kv_valid=kv_valid, tkv=tkv)


def flash_attention(q, k, v, mask, n_heads, *,
                    prefill_q_block=256, prefill_kv_block=512,
                    decode_kv_block=1024):
    """q: (BH, Sq, D); k/v: (BH, Sk, D); mask: (bsz, Sq, Sk) additive or None.

    Returns (BH, Sq, D).  BH = bsz * n_heads; heads of one batch element share
    the mask row (indexed in the BlockSpec -- never broadcast per head).
    """
    BH, Sq, D = q.shape
    Sk = k.shape[1]
    assert BH % n_heads == 0

    decode = (Sq == 1)
    if decode:
        # Pack several heads per step (fills sublanes, amortizes grid-step
        # overhead); score slab stays tiny because tq == 1.
        hb = 1
        for cand in (8, 4, 2, 1):
            if n_heads % cand == 0:
                hb = cand
                break
        tq = 1
        kv_block = decode_kv_block
    else:
        # Prefill: one head per step keeps the (hb, tq, tkv) scores slab at
        # <= ~0.5 MiB f32, well inside the vreg/VMEM budget -> no spill.
        hb = 1
        tq = min(Sq, prefill_q_block)
        kv_block = prefill_kv_block
    n_hblk = n_heads // hb
    tkv = min(Sk, kv_block)

    Sq_p, Sk_p = _round_up(Sq, tq), _round_up(Sk, tkv)
    neg = float(jnp.finfo(jnp.float32).min)
    if Sq_p != Sq:
        q = jnp.pad(q, ((0, 0), (0, Sq_p - Sq), (0, 0)))
    if Sk_p != Sk:
        k = jnp.pad(k, ((0, 0), (0, Sk_p - Sk), (0, 0)))
        v = jnp.pad(v, ((0, 0), (0, Sk_p - Sk), (0, 0)))

    has_mask = mask is not None
    kv_valid = None if (has_mask or Sk_p == Sk) else Sk
    if has_mask and (Sq_p, Sk_p) != (Sq, Sk):
        mask = jnp.pad(mask, ((0, 0), (0, Sq_p - Sq), (0, Sk_p - Sk)),
                       constant_values=neg)

    grid = (BH // hb, Sq_p // tq, Sk_p // tkv)
    scale = 1.0 / math.sqrt(D)

    in_specs = [
        pl.BlockSpec((hb, tq, D), lambda i, qi, kv: (i, qi, 0)),
        pl.BlockSpec((hb, tkv, D), lambda i, qi, kv: (i, kv, 0)),
        pl.BlockSpec((hb, tkv, D), lambda i, qi, kv: (i, kv, 0)),
    ]
    args = [q, k, v]
    if has_mask:
        # mask is per batch: head-block i belongs to batch i // n_hblk
        in_specs.append(pl.BlockSpec((1, tq, tkv),
                                     lambda i, qi, kv: (i // n_hblk, qi, kv)))
        args.append(mask.astype(jnp.float32))
        kernel = functools.partial(_flash_kernel_masked, scale=scale,
                                   kv_valid=kv_valid, tkv=tkv)
    else:
        kernel = functools.partial(_flash_kernel_nomask, scale=scale,
                                   kv_valid=kv_valid, tkv=tkv)

    out = pl.pallas_call(
        kernel,
        out_shape=jax.ShapeDtypeStruct((BH, Sq_p, D), q.dtype),
        grid_spec=pltpu.PrefetchScalarGridSpec(
            num_scalar_prefetch=0,
            grid=grid,
            in_specs=in_specs,
            out_specs=pl.BlockSpec((hb, tq, D), lambda i, qi, kv: (i, qi, 0)),
            scratch_shapes=[
                pltpu.VMEM((hb, tq, 1), jnp.float32),   # running max
                pltpu.VMEM((hb, tq, 1), jnp.float32),   # running sum
                pltpu.VMEM((hb, tq, D), jnp.float32),   # output accumulator
            ],
        ),
        compiler_params=pltpu.CompilerParams(
            dimension_semantics=("parallel", "parallel", "arbitrary"),
            vmem_limit_bytes=_vmem_limit_bytes(),
        ),
    )(*args)

    if Sq_p != Sq:
        out = out[:, :Sq, :]
    return out


# --------------------------------------------------------------------------
# Full module forward (mirrors QuantAttentionFusedBaichuan13B.forward)
# --------------------------------------------------------------------------
def baichuan13b_attention_forward(
    hidden_states,        # (bsz, q_len, hidden)
    w_pack,               # (3*hidden, hidden)  -- torch nn.Linear weight layout
    w_o,                  # (hidden, hidden)
    n_heads,
    attention_mask=None,  # (bsz, 1, q_len, kv_len) additive mask or None
    past_key_value=None,  # optional (k, v) each (bsz, n_heads, past_len, head_dim)
    use_cache=False,
    w_pack_scale=None,    # optional (3*hidden,) f32 per-channel scales (int8 W_pack)
    w_o_scale=None,       # optional (hidden,)   f32 per-channel scales (int8 o_proj)
):
    bsz, q_len, hidden = hidden_states.shape
    head_dim = hidden // n_heads

    # ---- QKV projection (tiled Pallas GEMM, weight kept in (N, K) layout) ----
    # TODO(synk): MixQ also quantizes activations per-token; here only the
    # weight-only int8 path (1 byte/weight HBM, per-channel scale) is wired.
    x2d = hidden_states.reshape(bsz * q_len, hidden)
    proj = linear_no_bias(x2d, w_pack, w_pack_scale)       # (bsz*q_len, 3*hidden)
    proj = proj.reshape(bsz, q_len, 3, hidden)

    def to_heads(t):  # (bsz, q_len, hidden) -> (bsz, n_heads, q_len, head_dim)
        return t.reshape(bsz, q_len, n_heads, head_dim).transpose(0, 2, 1, 3)

    query_states = to_heads(proj[:, :, 0, :])
    key_states = to_heads(proj[:, :, 1, :])
    value_states = to_heads(proj[:, :, 2, :])

    if past_key_value is not None:
        # TODO(synk): replace with a preallocated KV cache updated in place via
        # input_output_aliases (the torch module's growing-concat semantics are
        # kept here on purpose).
        key_states = jnp.concatenate([past_key_value[0], key_states], axis=2)
        value_states = jnp.concatenate([past_key_value[1], value_states], axis=2)
    new_past = (key_states, value_states) if use_cache else None
    kv_len = key_states.shape[2]

    # ---- attention mask: keep a single per-batch copy (bsz, q_len, kv_len) ----
    if attention_mask is not None:
        m = attention_mask
        if q_len == 1:                         # matches the torch q_len==1 branch
            m = m[:, :, -1:, :] if m.ndim == 4 else m[:, -1:, :]
        if m.ndim == 4:
            # HF masks are head-broadcast (bsz, 1, q, kv); drop the head dim.
            m = m[:, 0]
        mask3 = jnp.broadcast_to(m.astype(jnp.float32), (bsz, q_len, kv_len))
    else:
        mask3 = None   # no zeros mask is materialized / streamed

    # ---- attention core (flash kernel) ----
    qf = query_states.reshape(bsz * n_heads, q_len, head_dim)
    kf = key_states.reshape(bsz * n_heads, kv_len, head_dim)
    vf = value_states.reshape(bsz * n_heads, kv_len, head_dim)

    attn_out = flash_attention(qf, kf, vf, mask3, n_heads)  # (B*H, q_len, D)
    attn_out = attn_out.reshape(bsz, n_heads, q_len, head_dim)
    attn_out = attn_out.transpose(0, 2, 1, 3).reshape(bsz, q_len, hidden)

    # ---- output projection (tiled Pallas GEMM) ----
    out = linear_no_bias(attn_out.reshape(bsz * q_len, hidden), w_o, w_o_scale)
    out = out.reshape(bsz, q_len, hidden)

    # output_attentions=False -> attn_weights is None
    return out, None, new_past


# --------------------------------------------------------------------------
# Pure-JAX reference (same math) for correctness checks
# --------------------------------------------------------------------------
def _reference_forward(hs, w_pack, w_o, n_heads, attention_mask, past=None):
    bsz, q_len, hidden = hs.shape
    head_dim = hidden // n_heads
    proj = hs @ w_pack.T
    proj = proj.reshape(bsz, q_len, 3, hidden)

    def heads(t):
        return t.reshape(bsz, q_len, n_heads, head_dim).transpose(0, 2, 1, 3)

    q, k, v = heads(proj[:, :, 0]), heads(proj[:, :, 1]), heads(proj[:, :, 2])
    if past is not None:
        k = jnp.concatenate([past[0], k], axis=2)
        v = jnp.concatenate([past[1], v], axis=2)
    s = jnp.einsum("bhqd,bhkd->bhqk", q, k) / math.sqrt(head_dim)
    if attention_mask is not None:
        m = attention_mask
        if q_len == 1:
            m = m[:, :, -1:, :] if m.ndim == 4 else m[:, -1:, :]
        s = s + m
        s = jnp.maximum(s, jnp.finfo(s.dtype).min)
    p = jax.nn.softmax(s, axis=-1)
    o = jnp.einsum("bhqk,bhkd->bhqd", p, v)
    o = o.transpose(0, 2, 1, 3).reshape(bsz, q_len, hidden)
    return o @ w_o.T, (k, v)


if __name__ == "__main__":
    bsz, q_len, hidden, n_heads = 2, 8, 32, 4

    key = jax.random.PRNGKey(0)
    k1, k2, k3, k4, k5 = jax.random.split(key, 5)

    hidden_states = jax.random.normal(k1, (bsz, q_len, hidden), dtype=jnp.float32)
    # W_pack: Linear(hidden -> 3*hidden, bias=False); o_proj: Linear(hidden -> hidden)
    w_pack = jax.random.normal(k2, (3 * hidden, hidden), dtype=jnp.float32) * 0.05
    w_o = jax.random.normal(k3, (hidden, hidden), dtype=jnp.float32) * 0.05

    # ---- standalone check of the weight-only int8 GEMM path ----
    w_scale = jnp.max(jnp.abs(w_pack), axis=1) / 127.0
    w_int8 = jnp.clip(jnp.round(w_pack / w_scale[:, None]), -127, 127).astype(jnp.int8)
    x2d = hidden_states.reshape(bsz * q_len, hidden)
    out_q = jax.block_until_ready(linear_no_bias(x2d, w_int8, w_scale))
    ref_q = x2d @ (w_int8.astype(jnp.float32) * w_scale[:, None]).T
    assert jnp.allclose(out_q, ref_q, atol=2e-3, rtol=2e-2), "int8 GEMM mismatch"

    # HF-style additive causal mask: 0 for allowed, finfo.min for masked
    neg = jnp.finfo(jnp.float32).min
    causal = jnp.tril(jnp.ones((q_len, q_len), dtype=bool))
    mask4 = jnp.where(causal, 0.0, neg)[None, None, :, :].astype(jnp.float32)
    mask4 = jnp.broadcast_to(mask4, (bsz, 1, q_len, q_len))

    # ---- prefill (masked flash path, hb = 1) ----
    out, attn_w, past = baichuan13b_attention_forward(
        hidden_states, w_pack, w_o, n_heads,
        attention_mask=mask4, past_key_value=None, use_cache=True)
    out = jax.block_until_ready(out)

    ref, ref_past = _reference_forward(hidden_states, w_pack, w_o, n_heads, mask4)
    assert out.shape == (bsz, q_len, hidden)
    assert attn_w is None
    assert past is not None and past[0].shape == (bsz, n_heads, q_len, hidden // n_heads)
    assert jnp.allclose(out, ref, atol=2e-3, rtol=2e-2), "prefill mismatch vs reference"

    # ---- one decode step (q_len == 1, no mask -> no-mask kernel, hb packing) ----
    x_dec = jax.random.normal(k4, (bsz, 1, hidden), dtype=jnp.float32)
    out_d, _, past_d = baichuan13b_attention_forward(
        x_dec, w_pack, w_o, n_heads,
        attention_mask=None, past_key_value=past, use_cache=True)
    out_d = jax.block_until_ready(out_d)

    ref_d, _ = _reference_forward(x_dec, w_pack, w_o, n_heads, None, past=ref_past)
    assert out_d.shape == (bsz, 1, hidden)
    assert past_d[0].shape == (bsz, n_heads, q_len + 1, hidden // n_heads)
    assert jnp.allclose(out_d, ref_d, atol=2e-3, rtol=2e-2), "decode mismatch vs reference"

    print("KERNEL_OK")
</pallas_src>

<mosaic_0001>
module attributes {stable_mosaic.version = 11 : i64} {
  func.func @_matmul_nt_scaled_kernel(%arg0: i32, %arg1: i32, %arg2: i32, %arg3: memref<16x32xf32, #tpu.memory_space<vmem>>, %arg4: memref<96x32xi8, #tpu.memory_space<vmem>>, %arg5: memref<1x96xf32, #tpu.memory_space<vmem>>, %arg6: memref<16x96xf32, #tpu.memory_space<vmem>>, %arg7: memref<16x96xf32, #tpu.memory_space<vmem>>) attributes {dimension_semantics = [#tpu.dimension_semantics<parallel>, #tpu.dimension_semantics<parallel>, #tpu.dimension_semantics<arbitrary>], iteration_bounds = array<i64: 1, 1, 1>, scalar_prefetch = 0 : i64, scratch_operands = 1 : i64, tpu.core_type = #tpu.core_type<tc>, window_params = [{transform_indices = @transform_0, window_bounds = array<i64: 16, 32>}, {transform_indices = @transform_1, window_bounds = array<i64: 96, 32>}, {transform_indices = @transform_2, window_bounds = array<i64: 1, 96>}, {transform_indices = @transform_3, window_bounds = array<i64: 16, 96>}]} {
    %c0_i32 = arith.constant 0 : i32
    %0 = arith.cmpi eq, %arg2, %c0_i32 : i32
    %1 = arith.extui %0 : i1 to i32
    %c0_i32_0 = arith.constant 0 : i32
    %2 = arith.cmpi ne, %1, %c0_i32_0 : i32
    scf.if %2 {
      %cst_10 = arith.constant 0.000000e+00 : f32
      %13 = vector.broadcast %cst_10 : f32 to vector<16x96xf32>
      %c0_11 = arith.constant 0 : index
      %c0_12 = arith.constant 0 : index
      %14 = vector.load %arg7[%c0_11, %c0_12] : memref<16x96xf32, #tpu.memory_space<vmem>>, vector<16x96xf32>
      tpu.vector_store %arg7[%c0_11, %c0_12], %13 {strides = array<i32>} : memref<16x96xf32, #tpu.memory_space<vmem>>, vector<16x96xf32>,
    } else {
    }
    %c0 = arith.constant 0 : index
    %c0_1 = arith.constant 0 : index
    %3 = vector.load %arg4[%c0, %c0_1] : memref<96x32xi8, #tpu.memory_space<vmem>>, vector<96x32xi8>
    %4 = arith.sitofp %3 : vector<96x32xi8> to vector<96x32xf32>
    %c0_2 = arith.constant 0 : index
    %c0_3 = arith.constant 0 : index
    %5 = vector.load %arg7[%c0_2, %c0_3] : memref<16x96xf32, #tpu.memory_space<vmem>>, vector<16x96xf32>
    %c0_4 = arith.constant 0 : index
    %c0_5 = arith.constant 0 : index
    %6 = vector.load %arg3[%c0_4, %c0_5] : memref<16x32xf32, #tpu.memory_space<vmem>>, vector<16x32xf32>
    %cst = arith.constant dense<0.000000e+00> : vector<16x96xf32>
    %7 = tpu.matmul %6, %4, %cst {dimension_numbers = #tpu.dot_dimension_numbers<[1], [1], [0], [0], [0, 0, 1, 0], [], []>} : vector<16x32xf32>, vector<96x32xf32>, vector<16x96xf32> -> vector<16x96xf32>
    %8 = arith.addf %5, %7 : vector<16x96xf32>
    %c0_6 = arith.constant 0 : index
    %c0_7 = arith.constant 0 : index
    %9 = vector.load %arg7[%c0_6, %c0_7] : memref<16x96xf32, #tpu.memory_space<vmem>>, vector<16x96xf32>
    tpu.vector_store %arg7[%c0_6, %c0_7], %8 {strides = array<i32>} : memref<16x96xf32, #tpu.memory_space<vmem>>, vector<16x96xf32>,
    %c0_i32_8 = arith.constant 0 : i32
    %10 = arith.cmpi eq, %arg2, %c0_i32_8 : i32
    %11 = arith.extui %10 : i1 to i32
    %c0_i32_9 = arith.constant 0 : i32
    %12 = arith.cmpi ne, %11, %c0_i32_9 : i32
    scf.if %12 {
      %c0_10 = arith.constant 0 : index
      %c0_11 = arith.constant 0 : index
      %13 = vector.load %arg7[%c0_10, %c0_11] : memref<16x96xf32, #tpu.memory_space<vmem>>, vector<16x96xf32>
      %c0_12 = arith.constant 0 : index
      %c0_13 = arith.constant 0 : index
      %14 = vector.load %arg5[%c0_12, %c0_13] : memref<1x96xf32, #tpu.memory_space<vmem>>, vector<1x96xf32>
      %15 = vector.broadcast %14 : vector<1x96xf32> to vector<16x96xf32>
      %16 = arith.mulf %13, %15 : vector<16x96xf32>
      %c0_14 = arith.constant 0 : index
      %c0_15 = arith.constant 0 : index
      %17 = vector.load %arg6[%c0_14, %c0_15] : memref<16x96xf32, #tpu.memory_space<vmem>>, vector<16x96xf32>
      tpu.vector_store %arg6[%c0_14, %c0_15], %16 {strides = array<i32>} : memref<16x96xf32, #tpu.memory_space<vmem>>, vector<16x96xf32>,
    } else {
    }
    return
  }
  func.func @transform_0(%arg0: i32, %arg1: i32, %arg2: i32) -> (i32, i32) {
    %c0_i32 = arith.constant 0 : i32
    return %arg0, %arg2 : i32, i32
  }
  func.func @transform_1(%arg0: i32, %arg1: i32, %arg2: i32) -> (i32, i32) {
    %c0_i32 = arith.constant 0 : i32
    return %arg1, %arg2 : i32, i32
  }
  func.func @transform_2(%arg0: i32, %arg1: i32, %arg2: i32) -> (i32, i32) {
    %c0_i32 = arith.constant 0 : i32
    %c0_i32_0 = arith.constant 0 : i32
    return %c0_i32, %arg1 : i32, i32
  }
  func.func @transform_3(%arg0: i32, %arg1: i32, %arg2: i32) -> (i32, i32) {
    %c0_i32 = arith.constant 0 : i32
    return %arg0, %arg1 : i32, i32
  }
}

</mosaic_0001>

<bundles_post_ra>
// kernel: tpu_custom_call.1
= control target key start
LH: loop header
LB: loop body
LE: loop exit
PB: predicated region body
PF: predicated region fallthrough
CT: control target
= control target key end

     0   :  { %vm53_vm0 = vcmask 261120   ;;  %vm19_vm1 = vcmask 785408   ;;  %v340_v5 = vmov 0.0   ;;  %s432_s0 = inlined_call_operand.vmem [shape: f32[16,32], index: 0, kind: input, shape index: {}]   ;;  %s433_s1 = inlined_call_operand.vmem [shape: s8[96,32], index: 1, kind: input, shape index: {}]   ;;  %s434_s2 = inlined_call_operand.vmem [shape: f32[1,96], index: 2, kind: input, shape index: {}]   ;;  %s435_s3 = inlined_call_operand.hbm [shape: f32[16,96], index: 3, kind: output, shape index: {}]  }
   0x1   :  { %v22_v0 = vld [vmem:[%s433_s1] sm:$0xff]  ;;  %vm369_vm2 = vmpackc.low %vm53_vm0, %vm53_vm0  ;;  %21 = vst.msk [vmem:[#allocation2 + $0x8] sm:$0xff] %vm19_vm1, %v340_v5 }
   0x2   :  { %v300_v1 = vunpack.c.l.s8.bf16 %v22_v0  ;;  %v302_v3 = vunpack.c.h.s8.bf16 %v22_v0  ;;  %v51_v4 = vld [vmem:[%s432_s0] sm:$0xff]  ;;  %20 = vst.msk [vmem:[#allocation2] sm:$0xff] %vm19_vm1, %v340_v5 }
   0x3   :  { %261 = vmatprep.mubr.msk.f32.mxu0 %vm53_vm0, %v51_v4 }
   0x4   :  { %8 = vsyncpa [#allocation4], 0  ;;  %266 = vmatprep.subr.msk.bf16.mxu0 %vm369_vm2, %v300_v1  ;;  %v23_v6 = vld [vmem:[%s433_s1 + $0x8] sm:$0xff]  ;;  %v24_v9 = vld [vmem:[%s433_s1 + $0x10] sm:$0xff]  ;;  %s341_s23 = smov [#allocation3]  }
   0x5   :  { %269 = vmatpush3.bf16.xpose.msk.msra.mxu0 %vm369_vm2, %v300_v1  ;;  %v304_v7 = vunpack.c.l.s8.bf16 %v23_v6  ;;  %v306_v8 = vunpack.c.h.s8.bf16 %v23_v6  ;;  %v308_v10 = vunpack.c.l.s8.bf16 %v24_v9  ;;  %v310_v11 = vunpack.c.h.s8.bf16 %v24_v9  ;;  %v52_v12 = vld [vmem:[%s432_s0 + $0x8] sm:$0xff]  ;;  %v222_v19 = vld [vmem:[%s434_s2] ss:$0 sm:$0xff]  ;;  %s197_s24 = sshll.u32 %s341_s23, 4  ;;  %s198_s24 = int_to_ptr.vmem [resolvable:$true] %s197_s24 }
   0x6   :  { %272 = vmatprep.subr.msk.bf16.mxu0 %vm369_vm2, %v302_v3  ;;  %s316_s0 = scalar_lea.vmem %s198_s24, 256  ;;  %p321_p1 = scmp.lt.s32.totalorder %s198_s24, %s198_s24 }
   0x7   :  { %p317_p0 = scmp.ne.s32.totalorder %s198_s24, %s316_s0  ;;  %p322_p2 = scmp.lt.s32.totalorder %s316_s0, %s316_s0 }
   0x8   :  { %v50_v13 = vld [vmem:[#allocation2 + $0x8] sm:$0xff] }
   0x9   :  { %v49_v14 = vld [vmem:[#allocation2] sm:$0xff]  ;;  %p323_p3 = por %p322_p2, %p321_p1 }
   0xb   :  { %p324_p4 = pnand %p323_p3, %p317_p0 }
   0xd   :  { %275 = vmatpush3.bf16.xpose.msk.msra.mxu0 %vm369_vm2, %v302_v3 }
   0xe   :  { %278 = vmatprep.subr.msk.bf16.mxu0 %vm369_vm2, %v304_v7 }
  0x15   :  { %281 = vmatpush3.bf16.xpose.msk.msra.mxu0 %vm369_vm2, %v304_v7 }
  0x16   :  { %284 = vmatprep.subr.msk.bf16.mxu0 %vm369_vm2, %v306_v8 }
  0x1d   :  { %287 = vmatpush3.bf16.xpose.msk.msra.mxu0 %vm369_vm2, %v306_v8 }
  0x1e   :  { %290 = vmatprep.subr.msk.bf16.mxu0 %vm369_vm2, %v308_v10 }
  0x25   :  { %293 = vmatpush3.bf16.xpose.msk.msra.mxu0 %vm369_vm2, %v308_v10 }
  0x26   :  { %296 = vmatprep.subr.msk.bf16.mxu0 %vm369_vm2, %v310_v11 }
  0x2d   :  { %299 = vmatpush3.bf16.xpose.msk.msra.mxu0 %vm369_vm2, %v310_v11 }
  0x34   :  { %262 = vmatmul.mubr.msk.f32.vlgmr.msra.gmra.mrb[0].mxu0 %vm53_vm0, %v52_v12 }
 0x107   :  { %v263_v15 = vpop.f32.mrb[0].mxu0 }
 0x108   :  { %v172_v16 = vadd.f32 %v263_v15, %v50_v13  ;;  %v162_v17 = vpop.f32.mrb[1].mxu0 }
 0x109   :  { %v171_v18 = vadd.f32 %v162_v17, %v49_v14 }
 0x10a   :  { %175 = vst.msk [vmem:[#allocation2 + $0x8] sm:$0xff] %vm19_vm1, %v172_v16 }
 0x10b   :  { %174 = vst.msk [vmem:[#allocation2] sm:$0xff] %vm19_vm1, %v171_v18 }
 0x111   :  { %v180_v20 = vld [vmem:[#allocation2 + $0x8] sm:$0xff] }
 0x112   :  { %v179_v21 = vld [vmem:[#allocation2] sm:$0xff]  ;;  %v189_v22 = vmul.f32 %v222_v19, %v180_v20 }
 0x113   :  { %v188_v23 = vmul.f32 %v222_v19, %v179_v21 }
 0x114   :  { %191 = vst.msk [vmem:[#allocation3 + $0x8] sm:$0xff] %vm19_vm1, %v189_v22 }
 0x115   :  { %190 = vst.msk [vmem:[#allocation3] sm:$0xff] %vm19_vm1, %v188_v23 }
 0x116   :  { %327 = shalt.err (!%p324_p4)
}
 0x117   :  { %s328_s26 = scalar_lea.hbm %s435_s3, 256 }
 0x118   :  { %p329_p5 = scmp.ne.s32.totalorder %s435_s3, %s328_s26  ;;  %p332_p6 = scmp.lt.u32.totalorder %s328_s26, %s435_s3 }
 0x11a   :  { %p334_p7 = pnand %p332_p6, %p329_p5 }
 0x11c   :  { %337 = shalt.err (!%p334_p7)
}
 0x11d   :  { %s342_s4 = smov 128   ;;  %s343_s5 = smov 8  }
 0x11e   :  { %203 = dma.vmem_to_hbm [thread:$0]  %s198_s24, 256, %s435_s3, [#allocation4], %s342_s4, %s342_s4, %s343_s5  }
 0x11f   :  { %338 = dma.done.wait [#allocation4], 256  }
 0x120   :  { %339 = vsyncadd [#allocation4], 4294967040 }
 0x121   :  { %207 = vsyncpa [#allocation4], 1 }

</bundles_post_ra>
